<compile_context>
chip_gen: v6e
topology: v6e:2x2x1
jax: 0.10.0
libtpu: 0.0.40
codegen_flags: <defaults>
</compile_context>

<pallas_src>
import math
import numpy as np
import jax
import jax.numpy as jnp
from jax import lax
from jax.experimental import pallas as pl
from jax.experimental.pallas import tpu as pltpu


def _make_bsconvs_kernel(H, W):
    HW = H * W

    def kernel(x_ref, w_ref, dwk_ref, b_ref, rc_ref, o_ref):
        # x_ref:  (1, Cin, HW)   one image in NC(HW) layout (free reshape of NCHW)
        # w_ref:  (Cout, Cin)    fused pointwise weight  (w2 @ w1)
        # dwk_ref:(Cout, 9)      depthwise 3x3 taps, column = kh*3 + kw
        # b_ref:  (Cout, 1)      depthwise bias
        # rc_ref: (2, HW)        int32 row / col index of each flattened pixel
        # o_ref:  (1, Cout, HW)
        x = x_ref[0].astype(jnp.float32)          # (Cin, HW)
        w = w_ref[...].astype(jnp.float32)        # (Cout, Cin)
        Cin = x.shape[0]
        Cout = w.shape[0]

        # ---- fused 1x1 conv (pw2 o pw1) ----
        if Cin <= 16:
            # tiny contraction: Cin broadcast-multiply-adds on the VPU (dense lanes)
            fea = w[:, 0:1] * x[0:1, :]                              # (Cout, HW)
            for ci in range(1, Cin):
                fea = fea + w[:, ci:ci + 1] * x[ci:ci + 1, :]
        else:
            # larger channel counts: let the MXU do it
            fea = jnp.dot(w, x, preferred_element_type=jnp.float32)  # (Cout, HW)

        # ---- depthwise 3x3, stride 1, zero padding 1 ----
        row = rc_ref[0:1, :]                      # (1, HW) int32
        col = rc_ref[1:2, :]                      # (1, HW) int32
        h_lo = row >= 1                           # h-1 in bounds
        h_hi = row <= H - 2                       # h+1 in bounds
        w_lo = col >= 1                           # w-1 in bounds
        w_hi = col <= W - 2                       # w+1 in bounds

        dwk = dwk_ref[...].astype(jnp.float32)    # (Cout, 9), loaded once
        bias = b_ref[...].astype(jnp.float32)     # (Cout, 1)

        acc = jnp.zeros((Cout, HW), jnp.float32)
        for dh in (-1, 0, 1):
            for dw in (-1, 0, 1):
                off = dh * W + dw
                k = (dh + 1) * 3 + (dw + 1)
                tap = dwk[:, k:k + 1]                                  # (Cout, 1)
                # shifted[i] = fea[i + off]; out-of-image taps are masked to 0 below.
                if off == 0:
                    shifted = fea
                else:
                    shifted = pltpu.roll(fea, (-off) % HW, axis=1)     # XLU lane rotate
                mask = None
                if dh == -1:
                    mask = h_lo
                elif dh == 1:
                    mask = h_hi
                if dw == -1:
                    mask = w_lo if mask is None else (mask & w_lo)
                elif dw == 1:
                    mask = w_hi if mask is None else (mask & w_hi)
                contrib = shifted if mask is None else jnp.where(mask, shifted, 0.0)
                acc = acc + tap * contrib

        acc = acc + bias
        o_ref[0] = acc.astype(o_ref.dtype)        # (Cout, HW): lane-dense, unmasked store

    return kernel


def bsconvs_pallas(x_nchw, w1, w2, dw_w, dw_b):
    """x_nchw: (N, Cin, H, W) float32.
    w1: (Cmid, Cin, 1, 1), w2: (Cout, Cmid, 1, 1), dw_w: (Cout, 1, 3, 3), dw_b: (Cout,).
    Returns (N, Cout, H, W)."""
    N, Cin, H, W = x_nchw.shape
    Cout = w2.shape[0]
    HW = H * W

    # free reshape (no transpose): channels stay leading, spatial flattened onto lanes
    x = x_nchw.reshape(N, Cin, HW)

    # exact fusion of the two bias-free pointwise convs: (Cout, Cin)
    w_fused = jnp.dot(w2[:, :, 0, 0], w1[:, :, 0, 0])

    dwk = dw_w[:, 0, :, :].reshape(Cout, 9)                 # column index = kh*3 + kw
    bias = dw_b.reshape(Cout, 1)

    # per-pixel (row, col) indices for halo masking (computed once, tiny)
    rr = jnp.repeat(jnp.arange(H, dtype=jnp.int32), W)
    cc = jnp.tile(jnp.arange(W, dtype=jnp.int32), H)
    rc = jnp.stack([rr, cc], axis=0)                        # (2, HW)

    out = pl.pallas_call(
        _make_bsconvs_kernel(H, W),
        out_shape=jax.ShapeDtypeStruct((N, Cout, HW), x_nchw.dtype),
        grid_spec=pltpu.PrefetchScalarGridSpec(
            num_scalar_prefetch=0,
            grid=(N,),
            in_specs=[
                pl.BlockSpec((1, Cin, HW), lambda n: (n, 0, 0)),
                pl.BlockSpec((Cout, Cin), lambda n: (0, 0)),
                pl.BlockSpec((Cout, 9), lambda n: (0, 0)),
                pl.BlockSpec((Cout, 1), lambda n: (0, 0)),
                pl.BlockSpec((2, HW), lambda n: (0, 0)),
            ],
            out_specs=pl.BlockSpec((1, Cout, HW), lambda n: (n, 0, 0)),
        ),
        compiler_params=pltpu.CompilerParams(dimension_semantics=("parallel",)),
    )(x, w_fused, dwk, bias, rc)

    return out.reshape(N, Cout, H, W)                       # free reshape back to NCHW


def bsconvs_reference(x_nchw, w1, w2, dw_w, dw_b):
    # pure-JAX reference mirroring the PyTorch module (unfused)
    fea = lax.conv_general_dilated(
        x_nchw, w1, window_strides=(1, 1), padding=[(0, 0), (0, 0)],
        dimension_numbers=("NCHW", "OIHW", "NCHW"))
    fea = lax.conv_general_dilated(
        fea, w2, window_strides=(1, 1), padding=[(0, 0), (0, 0)],
        dimension_numbers=("NCHW", "OIHW", "NCHW"))
    out = lax.conv_general_dilated(
        fea, dw_w, window_strides=(1, 1), padding=[(1, 1), (1, 1)],
        dimension_numbers=("NCHW", "OIHW", "NCHW"),
        feature_group_count=dw_w.shape[0])
    return out + dw_b.reshape(1, -1, 1, 1)


if __name__ == "__main__":
    # module config (BSConvS defaults): kernel 3x3, stride 1, pad 1, bias, p=0.25
    N, in_channels, H, W = 2, 4, 16, 16
    out_channels = 8
    p_ratio, min_mid = 0.25, 4
    mid_channels = min(in_channels, max(min_mid, math.ceil(p_ratio * in_channels)))  # = 4

    key = jax.random.PRNGKey(0)
    kx, k1, k2, k3, k4 = jax.random.split(key, 5)
    x = jax.random.normal(kx, (N, in_channels, H, W), dtype=jnp.float32)
    w1 = jax.random.normal(k1, (mid_channels, in_channels, 1, 1), dtype=jnp.float32) * 0.2
    w2 = jax.random.normal(k2, (out_channels, mid_channels, 1, 1), dtype=jnp.float32) * 0.2
    dw_w = jax.random.normal(k3, (out_channels, 1, 3, 3), dtype=jnp.float32) * 0.2
    dw_b = jax.random.normal(k4, (out_channels,), dtype=jnp.float32) * 0.1

    out = jax.block_until_ready(jax.jit(bsconvs_pallas)(x, w1, w2, dw_w, dw_b))
    ref = jax.block_until_ready(bsconvs_reference(x, w1, w2, dw_w, dw_b))

    assert out.shape == (N, out_channels, H, W), out.shape
    np.testing.assert_allclose(np.asarray(out), np.asarray(ref), rtol=1e-4, atol=1e-4)
    print("KERNEL_OK")
</pallas_src>

<mosaic_0001>
module attributes {stable_mosaic.version = 11 : i64} {
  func.func @kernel(%arg0: i32, %arg1: memref<1x4x256xf32, #tpu.memory_space<vmem>>, %arg2: memref<8x4xf32, #tpu.memory_space<vmem>>, %arg3: memref<8x9xf32, #tpu.memory_space<vmem>>, %arg4: memref<8x1xf32, #tpu.memory_space<vmem>>, %arg5: memref<2x256xi32, #tpu.memory_space<vmem>>, %arg6: memref<1x8x256xf32, #tpu.memory_space<vmem>>) attributes {dimension_semantics = [#tpu.dimension_semantics<parallel>], iteration_bounds = array<i64: 2>, scalar_prefetch = 0 : i64, scratch_operands = 0 : i64, tpu.core_type = #tpu.core_type<tc>, window_params = [{transform_indices = @transform_0, window_bounds = array<i64: 1, 4, 256>}, {pipeline_mode = #tpu.pipeline_mode<synchronous>, transform_indices = @transform_1, window_bounds = array<i64: 8, 4>}, {pipeline_mode = #tpu.pipeline_mode<synchronous>, transform_indices = @transform_2, window_bounds = array<i64: 8, 9>}, {pipeline_mode = #tpu.pipeline_mode<synchronous>, transform_indices = @transform_3, window_bounds = array<i64: 8, 1>}, {pipeline_mode = #tpu.pipeline_mode<synchronous>, transform_indices = @transform_4, window_bounds = array<i64: 2, 256>}, {transform_indices = @transform_5, window_bounds = array<i64: 1, 8, 256>}]} {
    %c0 = arith.constant 0 : index
    %c0_0 = arith.constant 0 : index
    %c0_1 = arith.constant 0 : index
    %0 = vector.load %arg1[%c0, %c0_0, %c0_1] : memref<1x4x256xf32, #tpu.memory_space<vmem>>, vector<1x4x256xf32>
    %1 = vector.shape_cast %0 : vector<1x4x256xf32> to vector<4x256xf32>
    %c0_2 = arith.constant 0 : index
    %c0_3 = arith.constant 0 : index
    %2 = vector.load %arg2[%c0_2, %c0_3] : memref<8x4xf32, #tpu.memory_space<vmem>>, vector<8x4xf32>
    %3 = vector.extract_strided_slice %2 {offsets = [0, 0], sizes = [8, 1], strides = [1, 1]} : vector<8x4xf32> to vector<8x1xf32>
    %4 = vector.extract_strided_slice %1 {offsets = [0, 0], sizes = [1, 256], strides = [1, 1]} : vector<4x256xf32> to vector<1x256xf32>
    %5 = vector.broadcast %3 : vector<8x1xf32> to vector<8x256xf32>
    %6 = vector.broadcast %4 : vector<1x256xf32> to vector<8x256xf32>
    %7 = arith.mulf %5, %6 : vector<8x256xf32>
    %8 = vector.extract_strided_slice %2 {offsets = [0, 1], sizes = [8, 1], strides = [1, 1]} : vector<8x4xf32> to vector<8x1xf32>
    %9 = vector.extract_strided_slice %1 {offsets = [1, 0], sizes = [1, 256], strides = [1, 1]} : vector<4x256xf32> to vector<1x256xf32>
    %10 = vector.broadcast %8 : vector<8x1xf32> to vector<8x256xf32>
    %11 = vector.broadcast %9 : vector<1x256xf32> to vector<8x256xf32>
    %12 = arith.mulf %10, %11 : vector<8x256xf32>
    %13 = arith.addf %7, %12 : vector<8x256xf32>
    %14 = vector.extract_strided_slice %2 {offsets = [0, 2], sizes = [8, 1], strides = [1, 1]} : vector<8x4xf32> to vector<8x1xf32>
    %15 = vector.extract_strided_slice %1 {offsets = [2, 0], sizes = [1, 256], strides = [1, 1]} : vector<4x256xf32> to vector<1x256xf32>
    %16 = vector.broadcast %14 : vector<8x1xf32> to vector<8x256xf32>
    %17 = vector.broadcast %15 : vector<1x256xf32> to vector<8x256xf32>
    %18 = arith.mulf %16, %17 : vector<8x256xf32>
    %19 = arith.addf %13, %18 : vector<8x256xf32>
    %20 = vector.extract_strided_slice %2 {offsets = [0, 3], sizes = [8, 1], strides = [1, 1]} : vector<8x4xf32> to vector<8x1xf32>
    %21 = vector.extract_strided_slice %1 {offsets = [3, 0], sizes = [1, 256], strides = [1, 1]} : vector<4x256xf32> to vector<1x256xf32>
    %22 = vector.broadcast %20 : vector<8x1xf32> to vector<8x256xf32>
    %23 = vector.broadcast %21 : vector<1x256xf32> to vector<8x256xf32>
    %24 = arith.mulf %22, %23 : vector<8x256xf32>
    %25 = arith.addf %19, %24 : vector<8x256xf32>
    %c0_4 = arith.constant 0 : index
    %c0_5 = arith.constant 0 : index
    %26 = vector.load %arg5[%c0_4, %c0_5] : memref<2x256xi32, #tpu.memory_space<vmem>>, vector<1x256xi32>
    %c1 = arith.constant 1 : index
    %c0_6 = arith.constant 0 : index
    %27 = vector.load %arg5[%c1, %c0_6] : memref<2x256xi32, #tpu.memory_space<vmem>>, vector<1x256xi32>
    %c1_i32 = arith.constant 1 : i32
    %28 = vector.broadcast %c1_i32 : i32 to vector<1x256xi32>
    %29 = arith.cmpi sge, %26, %28 : vector<1x256xi32>
    %c14_i32 = arith.constant 14 : i32
    %30 = vector.broadcast %c14_i32 : i32 to vector<1x256xi32>
    %31 = arith.cmpi sle, %26, %30 : vector<1x256xi32>
    %c1_i32_7 = arith.constant 1 : i32
    %32 = vector.broadcast %c1_i32_7 : i32 to vector<1x256xi32>
    %33 = arith.cmpi sge, %27, %32 : vector<1x256xi32>
    %c14_i32_8 = arith.constant 14 : i32
    %34 = vector.broadcast %c14_i32_8 : i32 to vector<1x256xi32>
    %35 = arith.cmpi sle, %27, %34 : vector<1x256xi32>
    %c0_9 = arith.constant 0 : index
    %c0_10 = arith.constant 0 : index
    %36 = vector.load %arg3[%c0_9, %c0_10] : memref<8x9xf32, #tpu.memory_space<vmem>>, vector<8x9xf32>
    %c0_11 = arith.constant 0 : index
    %c0_12 = arith.constant 0 : index
    %37 = vector.load %arg4[%c0_11, %c0_12] : memref<8x1xf32, #tpu.memory_space<vmem>>, vector<8x1xf32>
    %cst = arith.constant 0.000000e+00 : f32
    %38 = vector.broadcast %cst : f32 to vector<8x256xf32>
    %39 = vector.extract_strided_slice %36 {offsets = [0, 0], sizes = [8, 1], strides = [1, 1]} : vector<8x9xf32> to vector<8x1xf32>
    %c17_i32 = arith.constant 17 : i32
    %40 = tpu.dynamic_rotate %25 by %c17_i32 dim 1 : vector<8x256xf32>, i32 -> vector<8x256xf32>
    %41 = arith.andi %29, %33 : vector<1x256xi1>
    %cst_13 = arith.constant 0.000000e+00 : f32
    %42 = vector.shape_cast %41 : vector<1x256xi1> to vector<1x256xi1>
    %43 = vector.broadcast %42 : vector<1x256xi1> to vector<8x256xi1>
    %44 = vector.broadcast %cst_13 : f32 to vector<8x256xf32>
    %45 = arith.select %43, %40, %44 : vector<8x256xi1>, vector<8x256xf32>
    %46 = vector.broadcast %39 : vector<8x1xf32> to vector<8x256xf32>
    %47 = arith.mulf %46, %45 : vector<8x256xf32>
    %48 = arith.addf %38, %47 : vector<8x256xf32>
    %49 = vector.extract_strided_slice %36 {offsets = [0, 1], sizes = [8, 1], strides = [1, 1]} : vector<8x9xf32> to vector<8x1xf32>
    %c16_i32 = arith.constant 16 : i32
    %50 = tpu.dynamic_rotate %25 by %c16_i32 dim 1 : vector<8x256xf32>, i32 -> vector<8x256xf32>
    %cst_14 = arith.constant 0.000000e+00 : f32
    %51 = vector.shape_cast %29 : vector<1x256xi1> to vector<1x256xi1>
    %52 = vector.broadcast %51 : vector<1x256xi1> to vector<8x256xi1>
    %53 = vector.broadcast %cst_14 : f32 to vector<8x256xf32>
    %54 = arith.select %52, %50, %53 : vector<8x256xi1>, vector<8x256xf32>
    %55 = vector.broadcast %49 : vector<8x1xf32> to vector<8x256xf32>
    %56 = arith.mulf %55, %54 : vector<8x256xf32>
    %57 = arith.addf %48, %56 : vector<8x256xf32>
    %58 = vector.extract_strided_slice %36 {offsets = [0, 2], sizes = [8, 1], strides = [1, 1]} : vector<8x9xf32> to vector<8x1xf32>
    %c15_i32 = arith.constant 15 : i32
    %59 = tpu.dynamic_rotate %25 by %c15_i32 dim 1 : vector<8x256xf32>, i32 -> vector<8x256xf32>
    %60 = arith.andi %29, %35 : vector<1x256xi1>
    %cst_15 = arith.constant 0.000000e+00 : f32
    %61 = vector.shape_cast %60 : vector<1x256xi1> to vector<1x256xi1>
    %62 = vector.broadcast %61 : vector<1x256xi1> to vector<8x256xi1>
    %63 = vector.broadcast %cst_15 : f32 to vector<8x256xf32>
    %64 = arith.select %62, %59, %63 : vector<8x256xi1>, vector<8x256xf32>
    %65 = vector.broadcast %58 : vector<8x1xf32> to vector<8x256xf32>
    %66 = arith.mulf %65, %64 : vector<8x256xf32>
    %67 = arith.addf %57, %66 : vector<8x256xf32>
    %68 = vector.extract_strided_slice %36 {offsets = [0, 3], sizes = [8, 1], strides = [1, 1]} : vector<8x9xf32> to vector<8x1xf32>
    %c1_i32_16 = arith.constant 1 : i32
    %69 = tpu.dynamic_rotate %25 by %c1_i32_16 dim 1 : vector<8x256xf32>, i32 -> vector<8x256xf32>
    %cst_17 = arith.constant 0.000000e+00 : f32
    %70 = vector.shape_cast %33 : vector<1x256xi1> to vector<1x256xi1>
    %71 = vector.broadcast %70 : vector<1x256xi1> to vector<8x256xi1>
    %72 = vector.broadcast %cst_17 : f32 to vector<8x256xf32>
    %73 = arith.select %71, %69, %72 : vector<8x256xi1>, vector<8x256xf32>
    %74 = vector.broadcast %68 : vector<8x1xf32> to vector<8x256xf32>
    %75 = arith.mulf %74, %73 : vector<8x256xf32>
    %76 = arith.addf %67, %75 : vector<8x256xf32>
    %77 = vector.extract_strided_slice %36 {offsets = [0, 4], sizes = [8, 1], strides = [1, 1]} : vector<8x9xf32> to vector<8x1xf32>
    %78 = vector.broadcast %77 : vector<8x1xf32> to vector<8x256xf32>
    %79 = arith.mulf %78, %25 : vector<8x256xf32>
    %80 = arith.addf %76, %79 : vector<8x256xf32>
    %81 = vector.extract_strided_slice %36 {offsets = [0, 5], sizes = [8, 1], strides = [1, 1]} : vector<8x9xf32> to vector<8x1xf32>
    %c255_i32 = arith.constant 255 : i32
    %82 = tpu.dynamic_rotate %25 by %c255_i32 dim 1 : vector<8x256xf32>, i32 -> vector<8x256xf32>
    %cst_18 = arith.constant 0.000000e+00 : f32
    %83 = vector.shape_cast %35 : vector<1x256xi1> to vector<1x256xi1>
    %84 = vector.broadcast %83 : vector<1x256xi1> to vector<8x256xi1>
    %85 = vector.broadcast %cst_18 : f32 to vector<8x256xf32>
    %86 = arith.select %84, %82, %85 : vector<8x256xi1>, vector<8x256xf32>
    %87 = vector.broadcast %81 : vector<8x1xf32> to vector<8x256xf32>
    %88 = arith.mulf %87, %86 : vector<8x256xf32>
    %89 = arith.addf %80, %88 : vector<8x256xf32>
    %90 = vector.extract_strided_slice %36 {offsets = [0, 6], sizes = [8, 1], strides = [1, 1]} : vector<8x9xf32> to vector<8x1xf32>
    %c241_i32 = arith.constant 241 : i32
    %91 = tpu.dynamic_rotate %25 by %c241_i32 dim 1 : vector<8x256xf32>, i32 -> vector<8x256xf32>
    %92 = arith.andi %31, %33 : vector<1x256xi1>
    %cst_19 = arith.constant 0.000000e+00 : f32
    %93 = vector.shape_cast %92 : vector<1x256xi1> to vector<1x256xi1>
    %94 = vector.broadcast %93 : vector<1x256xi1> to vector<8x256xi1>
    %95 = vector.broadcast %cst_19 : f32 to vector<8x256xf32>
    %96 = arith.select %94, %91, %95 : vector<8x256xi1>, vector<8x256xf32>
    %97 = vector.broadcast %90 : vector<8x1xf32> to vector<8x256xf32>
    %98 = arith.mulf %97, %96 : vector<8x256xf32>
    %99 = arith.addf %89, %98 : vector<8x256xf32>
    %100 = vector.extract_strided_slice %36 {offsets = [0, 7], sizes = [8, 1], strides = [1, 1]} : vector<8x9xf32> to vector<8x1xf32>
    %c240_i32 = arith.constant 240 : i32
    %101 = tpu.dynamic_rotate %25 by %c240_i32 dim 1 : vector<8x256xf32>, i32 -> vector<8x256xf32>
    %cst_20 = arith.constant 0.000000e+00 : f32
    %102 = vector.shape_cast %31 : vector<1x256xi1> to vector<1x256xi1>
    %103 = vector.broadcast %102 : vector<1x256xi1> to vector<8x256xi1>
    %104 = vector.broadcast %cst_20 : f32 to vector<8x256xf32>
    %105 = arith.select %103, %101, %104 : vector<8x256xi1>, vector<8x256xf32>
    %106 = vector.broadcast %100 : vector<8x1xf32> to vector<8x256xf32>
    %107 = arith.mulf %106, %105 : vector<8x256xf32>
    %108 = arith.addf %99, %107 : vector<8x256xf32>
    %109 = vector.extract_strided_slice %36 {offsets = [0, 8], sizes = [8, 1], strides = [1, 1]} : vector<8x9xf32> to vector<8x1xf32>
    %c239_i32 = arith.constant 239 : i32
    %110 = tpu.dynamic_rotate %25 by %c239_i32 dim 1 : vector<8x256xf32>, i32 -> vector<8x256xf32>
    %111 = arith.andi %31, %35 : vector<1x256xi1>
    %cst_21 = arith.constant 0.000000e+00 : f32
    %112 = vector.shape_cast %111 : vector<1x256xi1> to vector<1x256xi1>
    %113 = vector.broadcast %112 : vector<1x256xi1> to vector<8x256xi1>
    %114 = vector.broadcast %cst_21 : f32 to vector<8x256xf32>
    %115 = arith.select %113, %110, %114 : vector<8x256xi1>, vector<8x256xf32>
    %116 = vector.broadcast %109 : vector<8x1xf32> to vector<8x256xf32>
    %117 = arith.mulf %116, %115 : vector<8x256xf32>
    %118 = arith.addf %108, %117 : vector<8x256xf32>
    %119 = vector.broadcast %37 : vector<8x1xf32> to vector<8x256xf32>
    %120 = arith.addf %118, %119 : vector<8x256xf32>
    %c0_22 = arith.constant 0 : index
    %c0_23 = arith.constant 0 : index
    %c0_24 = arith.constant 0 : index
    %121 = vector.load %arg6[%c0_22, %c0_23, %c0_24] : memref<1x8x256xf32, #tpu.memory_space<vmem>>, vector<1x8x256xf32>
    %122 = vector.shape_cast %121 : vector<1x8x256xf32> to vector<8x256xf32>
    %123 = vector.shape_cast %120 : vector<8x256xf32> to vector<1x8x256xf32>
    tpu.vector_store %arg6[%c0_22, %c0_23, %c0_24], %123 {strides = array<i32>} : memref<1x8x256xf32, #tpu.memory_space<vmem>>, vector<1x8x256xf32>,
    return
  }
  func.func @transform_0(%arg0: i32) -> (i32, i32, i32) {
    %c0_i32 = arith.constant 0 : i32
    %c0_i32_0 = arith.constant 0 : i32
    %c0_i32_1 = arith.constant 0 : i32
    return %arg0, %c0_i32, %c0_i32_0 : i32, i32, i32
  }
  func.func @transform_1(%arg0: i32) -> (i32, i32) {
    %c0_i32 = arith.constant 0 : i32
    %c0_i32_0 = arith.constant 0 : i32
    %c0_i32_1 = arith.constant 0 : i32
    return %c0_i32, %c0_i32_0 : i32, i32
  }
  func.func @transform_2(%arg0: i32) -> (i32, i32) {
    %c0_i32 = arith.constant 0 : i32
    %c0_i32_0 = arith.constant 0 : i32
    %c0_i32_1 = arith.constant 0 : i32
    return %c0_i32, %c0_i32_0 : i32, i32
  }
  func.func @transform_3(%arg0: i32) -> (i32, i32) {
    %c0_i32 = arith.constant 0 : i32
    %c0_i32_0 = arith.constant 0 : i32
    %c0_i32_1 = arith.constant 0 : i32
    return %c0_i32, %c0_i32_0 : i32, i32
  }
  func.func @transform_4(%arg0: i32) -> (i32, i32) {
    %c0_i32 = arith.constant 0 : i32
    %c0_i32_0 = arith.constant 0 : i32
    %c0_i32_1 = arith.constant 0 : i32
    return %c0_i32, %c0_i32_0 : i32, i32
  }
  func.func @transform_5(%arg0: i32) -> (i32, i32, i32) {
    %c0_i32 = arith.constant 0 : i32
    %c0_i32_0 = arith.constant 0 : i32
    %c0_i32_1 = arith.constant 0 : i32
    return %arg0, %c0_i32, %c0_i32_0 : i32, i32, i32
  }
}

</mosaic_0001>

<bundles_post_ra>
// kernel: squeeze.5
= control target key start
LH: loop header
LB: loop body
LE: loop exit
PB: predicated region body
PF: predicated region fallthrough
CT: control target
= control target key end

     0   :  { %vm17_vm0 = vcmask 64512   ;;  %s62_s0 = inlined_call_operand.vmem [shape: f32[8,3,3], index: 0, kind: input, shape index: {}]   ;;  %s63_s1 = inlined_call_operand.vmem [shape: f32[8,9], index: 1, kind: output, shape index: {}]  }
   0x1   :  { %v30_v0 = vld [vmem:[%s62_s0 + $0x8] sm:$0xf]  ;;  %v31_v1 = vld [vmem:[%s62_s0 + $0x4] sm:$0xf]  ;;  %v14_v2 = vld [vmem:[%s62_s0] sm:$0xf] }
   0x2   :  { %9 = vst [vmem:[#allocation0] sm:$0xf] %v30_v0  ;;  %13 = vst [vmem:[#allocation0 + $0x10] sm:$0xf] %v31_v1 }
   0x3   :  { %15 = vst [vmem:[#allocation0 + $0x8] sm:$0xf] %v14_v2 }
   0x9   :  { %v20_v4 = vld [vmem:[#allocation0 + $0x10] sm:$0x7]   ;;  %v25_v5 = vld [vmem:[#allocation0] sm:$0x7]  }
   0xa   :  { %v16_v3 = vld [vmem:[#allocation0 + $0x8] sm:$0x7]   ;;  %32 = vst.msk [vmem:[%s63_s1 + $0x3] sm:$0x7] %vm17_vm0, %v20_v4   ;;  %33 = vst.msk [vmem:[%s63_s1 + $0x6] sm:$0x7] %vm17_vm0, %v25_v5  }
   0xb   :  { %18 = vst.msk [vmem:[%s63_s1] sm:$0x7] %vm17_vm0, %v16_v3  }

// kernel: tile.9
= control target key start
LH: loop header
LB: loop body
LE: loop exit
PB: predicated region body
PF: predicated region fallthrough
CT: control target
= control target key end

     0   :  { %s7_s6 = smov 3  ;;  %s21_s9 = smov 3  ;;  %vm4_vm0 = vcmask 130048   ;;  %vm11_vm1 = vcmask 1048448   ;;  %vm18_vm2 = vcmask 917248   ;;  %vm25_vm3 = vcmask 786048   ;;  %s131_s0 = inlined_call_operand.vmem [shape: s32[16,16], index: 0, kind: input, shape index: {}]   ;;  %s132_s1 = inlined_call_operand.vmem [shape: s32[1,256], index: 1, kind: output, shape index: {}]  }
   0x1   :  { %v69_v0 = vld [vmem:[%s131_s0 + $0x7] ss:$8 sm:%s7_s6]   ;;  %s84_s10 = smov 112   ;;  %v71_v1 = vld [vmem:[%s131_s0 + $0x5] ss:$8 sm:%s21_s9]   ;;  %s14_s13 = smov 3 }
   0x2   :  { %9 = vrot.lane.b32.xlu0 %v69_v0, %s84_s10  ;;  %s85_s14 = smov 80   ;;  %v70_v2 = vld [vmem:[%s131_s0 + $0x6] ss:$8 sm:%s14_s13]   ;;  %s28_s17 = smov 3  ;;  %vm32_vm4 = vcmask 654848   ;;  %vm39_vm5 = vcmask 523648  }
   0x3   :  { %23 = vrot.lane.b32.xlu1 %v71_v1, %s85_s14  ;;  %v72_v3 = vld [vmem:[%s131_s0 + $0x4] ss:$8 sm:%s28_s17]   ;;  %s35_s20 = smov 3  ;;  %s42_s21 = smov 3  ;;  %vm46_vm6 = vcmask 392448   ;;  %vm53_vm7 = vcmask 261248  }
   0x4   :  { %s86_s22 = smov 96   ;;  %s87_s23 = smov 64   ;;  %v73_v4 = vld [vmem:[%s131_s0 + $0x3] ss:$8 sm:%s35_s20]   ;;  %v74_v5 = vld [vmem:[%s131_s0 + $0x2] ss:$8 sm:%s42_s21]  }
   0x5   :  { %s2_s26 = smov 3  ;;  %s49_s29 = smov 3 }
   0x6   :  { %16 = vrot.lane.b32.xlu0 %v70_v2, %s86_s22  ;;  %v3_v6 = vld [vmem:[%s131_s0] ss:$8 sm:%s2_s26]   ;;  %s88_s3 = smov 48   ;;  %s89_s4 = smov 32  }
   0x7   :  { %30 = vrot.lane.b32.xlu1 %v72_v3, %s87_s23  ;;  %5 = vst.msk [vmem:[#allocation0] ss:$8 sm:$0x3] %vm4_vm0, %v3_v6   ;;  %v75_v7 = vld [vmem:[%s131_s0 + $0x1] ss:$8 sm:%s49_s29]   ;;  %s90_s0 = smov 16  }
   0xa   :  { %37 = vrot.lane.b32.xlu0 %v73_v4, %s88_s3 }
   0xb   :  { %44 = vrot.lane.b32.xlu1 %v74_v5, %s89_s4 }
   0xe   :  { %51 = vrot.lane.b32.xlu0 %v75_v7, %s90_s0 }
  0x74   :  { %v10_v8 = vpop.permute.xlu0 %9  }
  0x75   :  { %12 = vst.msk [vmem:[#allocation0] ss:$8 sm:$0x3] %vm11_vm1, %v10_v8   ;;  %v24_v9 = vpop.permute.xlu1 %23  }
  0x78   :  { %v17_v10 = vpop.permute.xlu0 %16  }
  0x79   :  { %19 = vst.msk [vmem:[#allocation0] ss:$8 sm:$0x3] %vm18_vm2, %v17_v10   ;;  %v31_v11 = vpop.permute.xlu1 %30  }
  0x7a   :  { %26 = vst.msk [vmem:[#allocation0] ss:$8 sm:$0x3] %vm25_vm3, %v24_v9  }
  0x7b   :  { %33 = vst.msk [vmem:[#allocation0] ss:$8 sm:$0x3] %vm32_vm4, %v31_v11  }
  0x7c   :  { %v38_v12 = vpop.permute.xlu0 %37  }
  0x7d   :  { %40 = vst.msk [vmem:[#allocation0] ss:$8 sm:$0x3] %vm39_vm5, %v38_v12   ;;  %v45_v13 = vpop.permute.xlu1 %44  }
  0x7e   :  { %47 = vst.msk [vmem:[#allocation0] ss:$8 sm:$0x3] %vm46_vm6, %v45_v13  }
  0x80   :  { %v52_v14 = vpop.permute.xlu0 %51  }
  0x81   :  { %54 = vst.msk [vmem:[#allocation0] ss:$8 sm:$0x3] %vm53_vm7, %v52_v14  }
  0x88   :  { %v59_v15 = vld [vmem:[#allocation0] sm:$0x1]  ;;  %v64_v16 = vld [vmem:[#allocation0 + $0x8] sm:$0x1] }
  0x89   :  { %62 = vst [vmem:[%s132_s1] sm:$0x1] %v59_v15  ;;  %76 = vst [vmem:[%s132_s1 + $0x1] sm:$0x1] %v64_v16 }

// kernel: bsconvs_pallas.1
= control target key start
LH: loop header
LB: loop body
LE: loop exit
PB: predicated region body
PF: predicated region fallthrough
CT: control target
= control target key end

     0   :  { %s750_s18 = smov 0   ;;  %s1023_s0 = inlined_call_operand.vmem [shape: f32[2,4,256], index: 0, kind: input, shape index: {}]   ;;  %s1024_s1 = inlined_call_operand.vmem [shape: f32[8,4], index: 1, kind: input, shape index: {}]   ;;  %s1025_s2 = inlined_call_operand.vmem [shape: f32[8,9], index: 2, kind: input, shape index: {}]   ;;  %s1026_s3 = inlined_call_operand.vmem [shape: f32[8,1], index: 3, kind: input, shape index: {}]   ;;  %s1027_s4 = inlined_call_operand.vmem [shape: s32[2,256], index: 4, kind: input, shape index: {}]   ;;  %s1028_s5 = inlined_call_operand.vmem [shape: f32[2,8,256], index: 5, kind: output, shape index: {}]  }
   0x1 LB: > { %s643_s19 = sadd.s32 4294967295, %s701_s18   ;;  %p647_p0 = scmp.ge.s32.totalorder %s701_s18, 1  ;;  %s701_s18 = sphi %s750_s18, %s15_s18  }
   0x2   : > { %p187_p1 = scmp.lt.s32.totalorder %s701_s18, 3 }
   0x4   : > { %p188_p2 = pnand %p647_p0, %p187_p1 }
   0x5   : > { %p215_p3 = scmp.lt.s32.totalorder (!%p188_p2), %s643_s19, 1  ;;  %s712_s28 = smov (!%p188_p2), 17  }
   0x6   : > { %191 = sbr.rel (%p188_p2) target bundleno = 314 (0x13a), region = 40  ;;  %s713_s29 = smov (!%p188_p2), 16  }
   0x7   : > { %s714_s30 = smov (!%p188_p2), 15   ;;  %s715_s6 = smov (!%p188_p2), 127  }
   0x8   : > { %s716_s7 = smov (!%p188_p2), 113   ;;  %s717_s8 = smov (!%p188_p2), 1  }
   0x9   : > { %s718_s9 = smov (!%p188_p2), 111   ;;  %s719_s12 = smov (!%p188_p2), 112  }
   0xb   : > { %v226_v0 = vld [vmem:[%s1024_s1] sm:$0xff]  ;;  %v703_v1 = vmov 0   ;;  %v704_v2 = vmov 2   ;;  %v705_v3 = vmov 1   ;;  %v706_v4 = vmov 3   ;;  %s1058_s19 = smov (!%p215_p3, %s643_s19), 1 }
   0xc   : > { %682 = vset.pattern.permute.xlu0 %v703_v1  ;;  %684 = vset.pattern.permute.xlu1 %v704_v2  ;;  %v338_v5 = vld [vmem:[%s1025_s2] sm:$0xff]  ;;  %v707_v6 = vmov 4   ;;  %v708_v7 = vmov 6   ;;  %v709_v8 = vmov 5   ;;  %v710_v9 = vmov 7   ;;  %s655_s24 = sshll.u32 %s1058_s19, 3 }
   0xd   : > { %229 = vperm.xlu0 %682, %v226_v0   ;;  %280 = vperm.xlu1 %684, %v226_v0   ;;  %v711_v10 = vmov 8   ;;  %v233_v11 = vlaneseq  ;;  %s219_s27 = scalar_lea.vmem %s1023_s0, %s655_s24  ;;  %v339_v56 = vld [vmem:[%s1026_s3] sm:$0xff]  ;;  %s656_s17 = sshll.u32 %s1058_s19, 4 }
   0xe   : > { %v225_v17 = vld [vmem:[%s219_s27] sm:$0xff]  ;;  %s224_s22 = scalar_lea.vmem %s1028_s5, %s656_s17 }
   0xf   : > { %v234_v12 = vshrl.u32 %v233_v11, 7 }
  0x11   : > { %683 = vset.pattern.permute.xlu0 %v705_v3  ;;  %685 = vset.pattern.permute.xlu1 %v706_v4  ;;  %v778_v13 = vsub.s32 0, %v234_v12  ;;  %v239_v14 = vsub.s32 4, %v234_v12  ;;  %v780_v15 = vsub.s32 1, %v234_v12  ;;  %v263_v16 = vsub.s32 5, %v234_v12 }
  0x12   : > { %254 = vperm.xlu0 %683, %v226_v0   ;;  %306 = vperm.xlu1 %685, %v226_v0   ;;  %v285_v18 = vsub.s32 2, %v234_v12  ;;  %v289_v19 = vsub.s32 6, %v234_v12  ;;  %v311_v20 = vsub.s32 3, %v234_v12  ;;  %v315_v21 = vsub.s32 7, %v234_v12 }
  0x13   : > { %v236_v22 = vrot.slane %v225_v17, %v778_v13  ;;  %v240_v23 = vrot.slane %v225_v17, %v239_v14  ;;  %v260_v24 = vrot.slane %v225_v17, %v780_v15  ;;  %v264_v25 = vrot.slane %v225_v17, %v263_v16  ;;  %v835_v3 = vld [vmem:[%s1027_s4 + $0x1] ss:$2 sm:$0x3] }
  0x14   : > { %v286_v26 = vrot.slane %v225_v17, %v285_v18  ;;  %v290_v27 = vrot.slane %v225_v17, %v289_v19  ;;  %v312_v30 = vrot.slane %v225_v17, %v311_v20  ;;  %v316_v31 = vrot.slane %v225_v17, %v315_v21 }
  0x15   : > { %v246_v32 = vrot.slane %v236_v22, %v778_v13  ;;  %v250_v33 = vrot.slane %v240_v23, %v778_v13  ;;  %v270_v34 = vrot.slane %v260_v24, %v780_v15  ;;  %v274_v35 = vrot.slane %v264_v25, %v780_v15 }
  0x16   : > { %393 = vperm.xlu0 %683, %v338_v5   ;;  %686 = vset.pattern.permute.xlu1 %v703_v1  ;;  %v296_v36 = vrot.slane %v286_v26, %v285_v18  ;;  %v300_v37 = vrot.slane %v290_v27, %v285_v18  ;;  %v322_v38 = vrot.slane %v312_v30, %v311_v20  ;;  %vm336_vm1 = vcmp.ge.s32.totalorder %v835_v3, 1 }
  0x17   : > { %365 = vperm.xlu1 %686, %v338_v5   ;;  %v326_v39 = vrot.slane %v316_v31, %v311_v20  ;;  %vm337_vm3 = vcmp.le.s32.totalorder %v835_v3, 14  ;;  %v849_v12 = vand.u32 127, %v233_v11  ;;  %v436_v21 = vsel %vm336_vm1, 1, %v703_v1 }
  0x19   : > { %vm376_vm5 = vcmp.lt.s32.totalorder %v849_v12, 16  ;;  %vm346_vm6 = vcmp.lt.s32.totalorder %v849_v12, 17  ;;  %vm404_vm11 = vcmp.lt.s32.totalorder %v849_v12, 15  ;;  %vm433_vm15 = vcmp.lt.s32.totalorder %v849_v12, 1 }
  0x1a   : > { %688 = vset.pattern.permute.xlu0 %v706_v4 }
  0x1b   : > { %450 = vperm.xlu0 %688, %v338_v5   ;;  %687 = vset.pattern.permute.xlu1 %v704_v2  ;;  %v830_v2 = vld [vmem:[%s1027_s4] ss:$2 sm:$0x3] }
  0x1c   : > { %422 = vperm.xlu1 %687, %v338_v5   ;;  %vm334_vm0 = vcmp.ge.s32.totalorder %v830_v2, 1  ;;  %vm335_vm12 = vcmp.le.s32.totalorder %v830_v2, 14 }
  0x1d   : > { %vm349_vm2 = vmand %vm334_vm0, %vm336_vm1 }
  0x1e   : > { %vm407_vm4 = vmand %vm334_vm0, %vm337_vm3 }
  0x1f   : > { %689 = vset.pattern.permute.xlu0 %v707_v6  ;;  %v408_v17 = vsel %vm407_vm4, 1, %v703_v1 }
  0x20   : > { %458 = vperm.xlu0 %689, %v338_v5   ;;  %691 = vset.pattern.permute.xlu1 %v708_v7  ;;  %v350_v7 = vsel %vm349_vm2, 1, %v703_v1  ;;  %v412_v11 = vrot.slane %v408_v17, %v778_v13  ;;  %v416_v23 = vrot.slane %v408_v17, %v780_v15  ;;  %vm500_vm2 = vmand %vm335_vm12, %vm336_vm1  ;;  %vm469_vm1 = vcmp.lt.s32.totalorder %v849_v12, 127 }
  0x21   : > { %515 = vperm.xlu1 %691, %v338_v5   ;;  %v354_v14 = vrot.slane %v350_v7, %v778_v13  ;;  %v358_v16 = vrot.slane %v350_v7, %v780_v15 }
  0x22   : > { %vm883_vm13 = vcmp.eq.s32.totalorder %v412_v11, 1  ;;  %vm887_vm14 = vcmp.eq.s32.totalorder %v416_v23, 1 }
  0x23   : > { %vm863_vm7 = vcmp.eq.s32.totalorder %v354_v14, 1  ;;  %vm867_vm8 = vcmp.eq.s32.totalorder %v358_v16, 1 }
  0x24   : > { %690 = vset.pattern.permute.xlu0 %v709_v8 }
  0x25   : > { %486 = vperm.xlu0 %690, %v338_v5   ;;  %692 = vset.pattern.permute.xlu1 %v710_v9 }
  0x26   : > { %543 = vperm.xlu1 %692, %v338_v5  }
  0x29   : > { %693 = vset.pattern.permute.xlu0 %v711_v10  ;;  %v379_v10 = vsel %vm334_vm0, 1, %v703_v1 }
  0x2a   : > { %572 = vperm.xlu0 %693, %v338_v5   ;;  %v383_v18 = vrot.slane %v379_v10, %v778_v13  ;;  %v387_v19 = vrot.slane %v379_v10, %v780_v15  ;;  %v529_v10 = vsel %vm335_vm12, 1, %v703_v1 }
  0x2b   : > { %v533_v24 = vrot.slane %v529_v10, %v778_v13  ;;  %v537_v25 = vrot.slane %v529_v10, %v780_v15 }
  0x2c   : > { %vm871_vm9 = vcmp.eq.s32.totalorder %v383_v18, 1  ;;  %vm875_vm10 = vcmp.eq.s32.totalorder %v387_v19, 1 }
  0x2e   : > { %694 = vset.pattern.permute.xlu0 %v703_v1 }
  0x88   : > { %v230_v28 = vpop.permute.xlu0 %229  ;;  %v281_v29 = vpop.permute.xlu1 %280 }
  0x89   : > { %v251_v42 = vmul.f32 %v246_v32, %v230_v28  ;;  %v252_v43 = vmul.f32 %v250_v33, %v230_v28  ;;  %v301_v46 = vmul.f32 %v296_v36, %v281_v29  ;;  %v302_v47 = vmul.f32 %v300_v37, %v281_v29 }
  0x8a   : > { %v440_v29 = vrot.slane %v436_v21, %v778_v13  ;;  %v444_v32 = vrot.slane %v436_v21, %v780_v15 }
  0x8c   : > { %vm903_vm0 = vcmp.eq.s32.totalorder %v440_v29, 1  ;;  %vm911_vm4 = vcmp.eq.s32.totalorder %v444_v32, 1 }
  0x8d   : > { %v255_v40 = vpop.permute.xlu0 %254  ;;  %v307_v41 = vpop.permute.xlu1 %306 }
  0x8e   : > { %v275_v44 = vmul.f32 %v270_v34, %v255_v40  ;;  %v276_v45 = vmul.f32 %v274_v35, %v255_v40  ;;  %v327_v50 = vmul.f32 %v322_v38, %v307_v41  ;;  %v328_v51 = vmul.f32 %v326_v39, %v307_v41 }
  0x8f   : > { %v472_v35 = vsel %vm337_vm3, 1, %v703_v1 }
  0x90   : > { %v277_v48 = vadd.f32 %v275_v44, %v251_v42  ;;  %v278_v49 = vadd.f32 %v276_v45, %v252_v43 }
  0x91   : > { %v813_v58 = vpop.permute.xlu0 %393 }
  0x92   : > { %v303_v52 = vadd.f32 %v301_v46, %v277_v48  ;;  %v304_v53 = vadd.f32 %v302_v47, %v278_v49  ;;  %v811_v57 = vpop.permute.xlu1 %365  ;;  %v476_v47 = vrot.slane %v472_v35, %v778_v13 }
  0x94   : > { %v788_v54 = vadd.f32 %v327_v50, %v303_v52  ;;  %v790_v55 = vadd.f32 %v328_v51, %v304_v53 }
  0x96   : > { %342 = vrot.lane.b32.xlu1 %v790_v55, %s712_s28  ;;  %340 = vrot.lane.b32.xlu0 %v788_v54, %s712_s28  ;;  %v817_v60 = vpop.permute.xlu0 %450 }
  0x97   : > { %v815_v59 = vpop.permute.xlu1 %422 }
  0x9a   : > { %374 = vrot.lane.b32.xlu1 %v790_v55, %s713_s29  ;;  %372 = vrot.lane.b32.xlu0 %v788_v54, %s713_s29 }
  0x9b   : > { %v821_v62 = vpop.permute.xlu0 %458 }
  0x9c   : > { %v819_v61 = vpop.permute.xlu1 %515 }
  0x9e   : > { %400 = vrot.lane.b32.xlu1 %v788_v54, %s714_s30  ;;  %467 = vrot.lane.b32.xlu0 %v790_v55, %s715_s6 }
  0xa0   : > { %v825_v0 = vpop.permute.xlu0 %486 }
  0xa1   : > { %v823_v63 = vpop.permute.xlu1 %543 }
  0xa2   : > { %402 = vrot.lane.b32.xlu1 %v790_v55, %s714_s30  ;;  %493 = vrot.lane.b32.xlu0 %v788_v54, %s716_s7 }
  0xa5   : > { %v837_v5 = vpop.permute.xlu0 %572 }
  0xa6   : > { %429 = vrot.lane.b32.xlu1 %v788_v54, %s717_s8  ;;  %550 = vrot.lane.b32.xlu0 %v788_v54, %s718_s9 }
  0xaa   : > { %431 = vrot.lane.b32.xlu1 %v790_v55, %s717_s8  ;;  %581 = vperm.xlu0 %694, %v339_v56   ;;  %v501_v56 = vsel %vm500_vm2, 1, %v703_v1 }
  0xab   : > { %v505_v19 = vrot.slane %v501_v56, %v778_v13 }
  0xae   : > { %465 = vrot.lane.b32.xlu1 %v788_v54, %s715_s6 }
  0xb2   : > { %495 = vrot.lane.b32.xlu1 %v790_v55, %s716_s7 }
  0xb6   : > { %522 = vrot.lane.b32.xlu1 %v788_v54, %s719_s12 }
  0xba   : > { %524 = vrot.lane.b32.xlu1 %v790_v55, %s719_s12 }
  0xbe   : > { %552 = vrot.lane.b32.xlu1 %v790_v55, %s718_s9 }
 0x108   : > { %v343_v4 = vpop.permute.xlu1 %342  ;;  %v341_v8 = vpop.permute.xlu0 %340 }
 0x109   : > { %v347_v36 = vsel %vm346_vm6, %v341_v8, %v343_v4  ;;  %v348_v37 = vsel %vm346_vm6, %v343_v4, %v341_v8  ;;  %v480_v8 = vrot.slane %v472_v35, %v780_v15  ;;  %vm557_vm6 = vmand %vm335_vm12, %vm337_vm3  ;;  %vm963_vm3 = vcmp.eq.s32.totalorder %v505_v19, 1 }
 0x10a   : > { %v361_v48 = vsel %vm863_vm7, %v348_v37, 0.0  ;;  %v362_v49 = vsel %vm867_vm8, %v347_v36, 0.0  ;;  %vm497_vm8 = vcmp.lt.s32.totalorder %v849_v12, 113  ;;  %v461_v35 = vmul.f32 %v821_v62, %v788_v54 }
 0x10b   : > { %v368_v14 = vmul.f32 %v811_v57, %v361_v48  ;;  %vm952_vm7 = vcmp.eq.s32.totalorder %v480_v8, 1  ;;  %vm985_vm12 = vcmp.eq.s32.totalorder %v537_v25, 1 }
 0x10c   : > { %v375_v6 = vpop.permute.xlu1 %374  ;;  %v373_v22 = vpop.permute.xlu0 %372 }
 0x10d   : > { %v377_v30 = vsel %vm376_vm5, %v373_v22, %v375_v6  ;;  %v378_v31 = vsel %vm376_vm5, %v375_v6, %v373_v22  ;;  %vm940_vm5 = vcmp.eq.s32.totalorder %v476_v47, 1 }
 0x10e   : > { %v390_v40 = vsel %vm871_vm9, %v378_v31, 0.0  ;;  %v391_v41 = vsel %vm875_vm10, %v377_v30, 0.0  ;;  %v558_v30 = vsel %vm557_vm6, 1, %v703_v1  ;;  %vm526_vm10 = vcmp.lt.s32.totalorder %v849_v12, 112 }
 0x10f   : > { %v396_v52 = vmul.f32 %v813_v58, %v390_v40  ;;  %v397_v53 = vmul.f32 %v813_v58, %v391_v41  ;;  %v369_v58 = vmul.f32 %v811_v57, %v362_v49  ;;  %v562_v42 = vrot.slane %v558_v30, %v778_v13 }
 0x110   : > { %v401_v9 = vpop.permute.xlu1 %400  ;;  %v468_v4 = vpop.permute.xlu0 %467 }
 0x111   : > { %v398_v21 = vadd.f32 %v396_v52, %v368_v14  ;;  %v399_v22 = vadd.f32 %v397_v53, %v369_v58 }
 0x114   : > { %v403_v20 = vpop.permute.xlu1 %402  ;;  %v494_v3 = vpop.permute.xlu0 %493 }
 0x115   : > { %v405_v38 = vsel %vm404_vm11, %v401_v9, %v403_v20  ;;  %v406_v39 = vsel %vm404_vm11, %v403_v20, %v401_v9  ;;  %v509_v20 = vrot.slane %v501_v56, %v780_v15  ;;  %vm981_vm11 = vcmp.eq.s32.totalorder %v533_v24, 1 }
 0x116   : > { %v419_v50 = vsel %vm883_vm13, %v406_v39, 0.0  ;;  %v420_v51 = vsel %vm887_vm14, %v405_v38, 0.0  ;;  %v462_v39 = vmul.f32 %v821_v62, %v790_v55  ;;  %v566_v55 = vrot.slane %v558_v30, %v780_v15 }
 0x117   : > { %v425_v16 = vmul.f32 %v815_v59, %v419_v50  ;;  %v426_v17 = vmul.f32 %v815_v59, %v420_v51  ;;  %vm967_vm9 = vcmp.eq.s32.totalorder %v509_v20, 1  ;;  %vm554_vm13 = vcmp.lt.s32.totalorder %v849_v12, 111 }
 0x118   : > { %v430_v28 = vpop.permute.xlu1 %429  ;;  %vm567_vm14 = vcmp.eq.s32.totalorder %v562_v42, 1  ;;  %v551_v53 = vpop.permute.xlu0 %550 }
 0x119   : > { %v427_v26 = vadd.f32 %v425_v16, %v398_v21  ;;  %v428_v27 = vadd.f32 %v426_v17, %v399_v22 }
 0x11c   : > { %v432_v43 = vpop.permute.xlu1 %431 }
 0x11d   : > { %v434_v45 = vsel %vm433_vm15, %v430_v28, %v432_v43  ;;  %v435_v46 = vsel %vm433_vm15, %v432_v43, %v430_v28  ;;  %vm568_vm15 = vcmp.eq.s32.totalorder %v566_v55, 1 }
 0x11e   : > { %v447_v6 = vsel %vm903_vm0, %v435_v46, 0.0  ;;  %v448_v7 = vsel %vm911_vm4, %v434_v45, 0.0 }
 0x11f   : > { %v453_v11 = vmul.f32 %v817_v60, %v447_v6  ;;  %v454_v57 = vmul.f32 %v817_v60, %v448_v7 }
 0x120   : > { %v466_v9 = vpop.permute.xlu1 %465 }
 0x121   : > { %v470_v60 = vsel %vm469_vm1, %v466_v9, %v468_v4  ;;  %v471_v2 = vsel %vm469_vm1, %v468_v4, %v466_v9  ;;  %v455_v31 = vadd.f32 %v453_v11, %v427_v26  ;;  %v456_v32 = vadd.f32 %v454_v57, %v428_v27 }
 0x122   : > { %v483_v36 = vsel %vm940_vm5, %v470_v60, 0.0  ;;  %v484_v37 = vsel %vm952_vm7, %v471_v2, 0.0 }
 0x123   : > { %v463_v62 = vadd.f32 %v461_v35, %v455_v31  ;;  %v464_v43 = vadd.f32 %v462_v39, %v456_v32  ;;  %v489_v44 = vmul.f32 %v825_v0, %v483_v36  ;;  %v490_v45 = vmul.f32 %v825_v0, %v484_v37 }
 0x124   : > { %v496_v23 = vpop.permute.xlu1 %495 }
 0x125   : > { %v498_v33 = vsel %vm497_vm8, %v494_v3, %v496_v23  ;;  %v499_v34 = vsel %vm497_vm8, %v496_v23, %v494_v3  ;;  %v491_v0 = vadd.f32 %v489_v44, %v463_v62  ;;  %v492_v51 = vadd.f32 %v490_v45, %v464_v43 }
 0x126   : > { %v512_v54 = vsel %vm963_vm3, %v498_v33, 0.0  ;;  %v513_v41 = vsel %vm967_vm9, %v499_v34, 0.0 }
 0x127   : > { %v518_v47 = vmul.f32 %v819_v61, %v512_v54  ;;  %v519_v48 = vmul.f32 %v819_v61, %v513_v41 }
 0x128   : > { %v523_v38 = vpop.permute.xlu1 %522 }
 0x129   : > { %v520_v4 = vadd.f32 %v518_v47, %v491_v0  ;;  %v521_v6 = vadd.f32 %v519_v48, %v492_v51 }
 0x12c   : > { %v525_v46 = vpop.permute.xlu1 %524 }
 0x12d   : > { %v527_v49 = vsel %vm526_vm10, %v523_v38, %v525_v46  ;;  %v528_v13 = vsel %vm526_vm10, %v525_v46, %v523_v38 }
 0x12e   : > { %v540_v15 = vsel %vm981_vm11, %v527_v49, 0.0  ;;  %v541_v50 = vsel %vm985_vm12, %v528_v13, 0.0 }
 0x12f   : > { %v546_v52 = vmul.f32 %v823_v63, %v540_v15  ;;  %v547_v61 = vmul.f32 %v823_v63, %v541_v50  ;;  %v582_v63 = vpop.permute.xlu0 %581 }
 0x130   : > { %v553_v56 = vpop.permute.xlu1 %552 }
 0x131   : > { %v555_v7 = vsel %vm554_vm13, %v551_v53, %v553_v56  ;;  %v556_v8 = vsel %vm554_vm13, %v553_v56, %v551_v53  ;;  %v549_v16 = vadd.f32 %v547_v61, %v521_v6  ;;  %v548_v17 = vadd.f32 %v546_v52, %v520_v4 }
 0x132   : > { %v569_v9 = vsel %vm567_vm14, %v555_v7, 0.0  ;;  %v570_v10 = vsel %vm568_vm15, %v556_v8, 0.0 }
 0x133   : > { %v575_v14 = vmul.f32 %v837_v5, %v569_v9  ;;  %v576_v58 = vmul.f32 %v837_v5, %v570_v10 }
 0x135   : > { %v578_v18 = vadd.f32 %v576_v58, %v549_v16  ;;  %v577_v19 = vadd.f32 %v575_v14, %v548_v17 }
 0x137   : > { %v584_v20 = vadd.f32 %v582_v63, %v577_v19  ;;  %v585_v21 = vadd.f32 %v582_v63, %v578_v18 }
 0x139   : > { %586 = vst [vmem:[%s224_s22] sm:$0xff] %v584_v20  ;;  %587 = vst [vmem:[%s224_s22 + $0x8] sm:$0xff] %v585_v21 }
 0x13a PF: > { %s15_s18 = sadd.s32 1, %s701_s18  }
 0x13b   : > { %p12_p4 = scmp.ge.s32.totalorder %s15_s18, 4  }
 0x13d   :  { %14 = sbr.rel (!%p12_p4) target bundleno = 1 (0x1), region = 71 }

</bundles_post_ra>
